<compile_context>
chip_gen: v7x
topology: tpu7x:2x2x1
jax: 0.10.0
libtpu: 0.0.40
codegen_flags: <defaults>
</compile_context>

<pallas_src>
import math

import jax
import jax.numpy as jnp
from jax import lax
from jax.experimental import pallas as pl
from jax.experimental.pallas import tpu as pltpu

EPS = 1e-12  # F.normalize default eps


def _round_up(a, b):
    return (a + b - 1) // b * b


def _sublane_pack(dtype):
    # Rows per vreg sublane group: 8 for f32, 16 for bf16, 32 for int8/fp8.
    return max(8, 32 // jnp.dtype(dtype).itemsize)


# ----------------------------------------------------------------------------
# Kernels
# ----------------------------------------------------------------------------
def _nl_kernel(x_ref, w_ref, ix_ref, iw_ref, o_ref):
    """Single K block: whole reduction in one MXU pass, scale in the epilogue."""
    acc = lax.dot_general(
        x_ref[...], w_ref[...],                      # (tm, K) x (tn, K)
        dimension_numbers=(((1,), (1,)), ((), ())),  # contract last dims (x @ w.T)
        preferred_element_type=jnp.float32)
    # f32 scaling BEFORE the cast so zero-padded rows/cols stay exactly 0.
    o_ref[...] = (acc * ix_ref[...] * iw_ref[...]).astype(o_ref.dtype)


def _nl_kernel_ksplit(x_ref, w_ref, ix_ref, iw_ref, o_ref, acc_ref):
    """K-reduction fallback (grid axis 2 = 'arbitrary', f32 VMEM accumulator)."""
    k = pl.program_id(2)

    @pl.when(k == 0)
    def _init():
        acc_ref[...] = jnp.zeros_like(acc_ref)

    acc_ref[...] += lax.dot_general(
        x_ref[...], w_ref[...],
        dimension_numbers=(((1,), (1,)), ((), ())),
        preferred_element_type=jnp.float32)

    @pl.when(k == pl.num_programs(2) - 1)
    def _finalize():
        o_ref[...] = (acc_ref[...] * ix_ref[...] * iw_ref[...]).astype(o_ref.dtype)


# ----------------------------------------------------------------------------
# Wrapper
# ----------------------------------------------------------------------------
def normalized_linear(x, w, *, tm=None, tn=None, tk=None,
                      vmem_budget_bytes=26 << 20):
    """x: (M, K) activations, w: (N, K) weight. Returns (M, N) = xn @ wn.T."""
    M, K = x.shape
    N, Kw = w.shape
    assert K == Kw, "in_features mismatch"

    out_dtype = x.dtype
    itemsize = jnp.dtype(x.dtype).itemsize
    out_itemsize = jnp.dtype(out_dtype).itemsize
    sub_m = _sublane_pack(x.dtype)

    # --- row norms hoisted out of the kernel (one fused pass over x and w) ---
    sx = jnp.sum(jnp.square(x.astype(jnp.float32)), axis=1, keepdims=True)  # (M,1)
    sw = jnp.sum(jnp.square(w.astype(jnp.float32)), axis=1, keepdims=True)  # (N,1)
    inv_x = lax.rsqrt(jnp.maximum(sx, EPS * EPS))        # (M, 1) f32
    inv_w = lax.rsqrt(jnp.maximum(sw, EPS * EPS)).T      # (1, N) f32

    # --- tile selection -------------------------------------------------------
    auto_mn = tm is None and tn is None
    if tm is None:
        tm = min(512, _round_up(M, sub_m))
    if tn is None:
        tn = min(512, _round_up(N, 128))    # lane-dense (unmasked) output stores
    if auto_mn:
        # Keep >= 2 parallel output blocks so v7x's second TensorCore has work.
        while (_round_up(M, tm) // tm) * (_round_up(N, tn) // tn) < 2 and tn > 128:
            tn = _round_up(tn // 2, 128)

    def _vmem_use(tk_):
        inp = 2 * (tm + tn) * tk_ * itemsize      # double-buffered x / w tiles
        outp = 2 * tm * tn * out_itemsize         # double-buffered output tile
        acc = tm * tn * 4                         # f32 accumulator (k-split only)
        vecs = 2 * (tm + tn) * 4                  # inv_x / inv_w tiles
        return inp + outp + acc + vecs

    Kp_full = _round_up(K, 128)
    if tk is None:
        if _vmem_use(Kp_full) <= vmem_budget_bytes:
            tk = Kp_full                          # single K block (fast path)
        else:
            tk_max = 2048
            while tk_max > 128 and _vmem_use(tk_max) > vmem_budget_bytes:
                tk_max //= 2
            nk_steps = -(-Kp_full // tk_max)      # ceil
            tk = _round_up(-(-Kp_full // nk_steps), 128)  # minimize K padding

    Mp, Np, Kp = _round_up(M, tm), _round_up(N, tn), _round_up(K, tk)

    # Pad only when needed (padding a large weight is an extra HBM pass).
    # Zero-padded K columns contribute 0 to the dot product; norms were taken
    # from the unpadded arrays, so real rows/cols are exact.
    xp = x if (Mp, Kp) == (M, K) else jnp.pad(x, ((0, Mp - M), (0, Kp - K)))
    wp = w if (Np, Kp) == (N, K) else jnp.pad(w, ((0, Np - N), (0, Kp - K)))
    ixp = inv_x if Mp == M else jnp.pad(inv_x, ((0, Mp - M), (0, 0)))
    iwp = inv_w if Np == N else jnp.pad(inv_w, ((0, 0), (0, Np - N)))

    nk = Kp // tk
    cost = pl.CostEstimate(
        flops=2 * Mp * Np * Kp,
        transcendentals=0,
        bytes_accessed=int(xp.size * itemsize
                           + wp.size * itemsize * (Mp // tm)
                           + Mp * Np * out_itemsize
                           + ixp.size * 4 + iwp.size * 4 * (Mp // tm)),
    )
    compiler_params = pltpu.CompilerParams(
        dimension_semantics=(("parallel", "parallel") if nk == 1
                             else ("parallel", "parallel", "arbitrary")),
        vmem_limit_bytes=48 * 1024 * 1024,
    )

    if nk == 1:
        kernel = _nl_kernel
        grid_spec = pltpu.PrefetchScalarGridSpec(
            num_scalar_prefetch=0,
            grid=(Mp // tm, Np // tn),
            in_specs=[
                pl.BlockSpec((tm, Kp), lambda i, j: (i, 0)),   # x rows (reused over j)
                pl.BlockSpec((tn, Kp), lambda i, j: (j, 0)),   # W rows
                pl.BlockSpec((tm, 1), lambda i, j: (i, 0)),    # 1/||x_row||
                pl.BlockSpec((1, tn), lambda i, j: (0, j)),    # 1/||w_row||
            ],
            out_specs=pl.BlockSpec((tm, tn), lambda i, j: (i, j)),
        )
    else:
        kernel = _nl_kernel_ksplit
        grid_spec = pltpu.PrefetchScalarGridSpec(
            num_scalar_prefetch=0,
            grid=(Mp // tm, Np // tn, nk),
            in_specs=[
                pl.BlockSpec((tm, tk), lambda i, j, k: (i, k)),
                pl.BlockSpec((tn, tk), lambda i, j, k: (j, k)),
                pl.BlockSpec((tm, 1), lambda i, j, k: (i, 0)),
                pl.BlockSpec((1, tn), lambda i, j, k: (0, j)),
            ],
            out_specs=pl.BlockSpec((tm, tn), lambda i, j, k: (i, j)),
            scratch_shapes=[pltpu.VMEM((tm, tn), jnp.float32)],
        )

    out = pl.pallas_call(
        kernel,
        out_shape=jax.ShapeDtypeStruct((Mp, Np), out_dtype),
        grid_spec=grid_spec,
        compiler_params=compiler_params,
        cost_estimate=cost,
    )(xp, wp, ixp, iwp)

    if (Mp, Np) != (M, N):
        out = out[:M, :N]
    return out


# ----------------------------------------------------------------------------
# Init / reference
# ----------------------------------------------------------------------------
def init_weight(key, out_features, in_features, dtype=jnp.float32):
    # kaiming_uniform_(a=sqrt(5)) on a (out, in) matrix → bound = 1/sqrt(fan_in)
    bound = 1.0 / math.sqrt(in_features)
    return jax.random.uniform(
        key, (out_features, in_features), dtype=dtype, minval=-bound, maxval=bound)


def _reference(x, w):
    xn = x / jnp.maximum(jnp.linalg.norm(x, axis=1, keepdims=True), EPS)
    wn = w / jnp.maximum(jnp.linalg.norm(w, axis=1, keepdims=True), EPS)
    return xn @ wn.T


if __name__ == "__main__":
    key = jax.random.PRNGKey(0)
    kx, kw, kx2, kw2, kx3, kw3 = jax.random.split(key, 6)

    # --- small demo matching the module: batch=8, in_features=32, out_features=16
    batch, in_features, out_features = 8, 32, 16
    x = jax.random.normal(kx, (batch, in_features), dtype=jnp.float32)
    w = init_weight(kw, out_features, in_features, dtype=jnp.float32)
    out = jax.block_until_ready(normalized_linear(x, w))
    ref = _reference(x, w)
    assert out.shape == (batch, out_features)
    assert jnp.allclose(out, ref, atol=1e-5, rtol=1e-5), float(
        jnp.max(jnp.abs(out - ref)))

    # --- M/N padding + single-K-block fast path
    M2, K2, N2 = 64, 640, 192
    x2 = jax.random.normal(kx2, (M2, K2), dtype=jnp.float32)
    w2 = init_weight(kw2, N2, K2, dtype=jnp.float32)
    out2 = jax.block_until_ready(normalized_linear(x2, w2))
    ref2 = _reference(x2, w2)
    assert out2.shape == (M2, N2)
    assert jnp.allclose(out2, ref2, atol=2e-2, rtol=2e-2), float(
        jnp.max(jnp.abs(out2 - ref2)))

    # --- force the K-reduction kernel (explicit small tk → 3 k steps + K pad)
    out3 = jax.block_until_ready(normalized_linear(x2, w2, tk=256))
    assert jnp.allclose(out3, ref2, atol=2e-2, rtol=2e-2), float(
        jnp.max(jnp.abs(out3 - ref2)))

    # --- bf16 path (exercises 16-row sublane packing); norms/scale stay f32
    xb = jax.random.normal(kx3, (batch, in_features), dtype=jnp.bfloat16)
    wb = init_weight(kw3, out_features, in_features, dtype=jnp.bfloat16)
    outb = jax.block_until_ready(normalized_linear(xb, wb))
    refb = _reference(xb.astype(jnp.float32), wb.astype(jnp.float32))
    assert outb.shape == (batch, out_features)
    assert jnp.allclose(outb.astype(jnp.float32), refb, atol=6e-2, rtol=6e-2), float(
        jnp.max(jnp.abs(outb.astype(jnp.float32) - refb)))

    print("KERNEL_OK")
</pallas_src>

<mosaic_0001>
module attributes {stable_mosaic.version = 11 : i64} {
  func.func @_nl_kernel(%arg0: i32, %arg1: i32, %arg2: memref<8x128xf32, #tpu.memory_space<vmem>>, %arg3: memref<128x128xf32, #tpu.memory_space<vmem>>, %arg4: memref<8x1xf32, #tpu.memory_space<vmem>>, %arg5: memref<1x128xf32, #tpu.memory_space<vmem>>, %arg6: memref<8x128xf32, #tpu.memory_space<vmem>>) attributes {dimension_semantics = [#tpu.dimension_semantics<parallel>, #tpu.dimension_semantics<parallel>], iteration_bounds = array<i64: 1, 1>, scalar_prefetch = 0 : i64, scratch_operands = 0 : i64, tpu.core_type = #tpu.core_type<tc>, window_params = [{transform_indices = @transform_0, window_bounds = array<i64: 8, 128>}, {transform_indices = @transform_1, window_bounds = array<i64: 128, 128>}, {transform_indices = @transform_2, window_bounds = array<i64: 8, 1>}, {transform_indices = @transform_3, window_bounds = array<i64: 1, 128>}, {transform_indices = @transform_4, window_bounds = array<i64: 8, 128>}]} {
    %c0 = arith.constant 0 : index
    %c0_0 = arith.constant 0 : index
    %0 = vector.load %arg2[%c0, %c0_0] : memref<8x128xf32, #tpu.memory_space<vmem>>, vector<8x128xf32>
    %c0_1 = arith.constant 0 : index
    %c0_2 = arith.constant 0 : index
    %1 = vector.load %arg3[%c0_1, %c0_2] : memref<128x128xf32, #tpu.memory_space<vmem>>, vector<128x128xf32>
    %cst = arith.constant dense<0.000000e+00> : vector<8x128xf32>
    %2 = tpu.matmul %0, %1, %cst {dimension_numbers = #tpu.dot_dimension_numbers<[1], [1], [0], [0], [0, 0, 1, 0], [], []>} : vector<8x128xf32>, vector<128x128xf32>, vector<8x128xf32> -> vector<8x128xf32>
    %c0_3 = arith.constant 0 : index
    %c0_4 = arith.constant 0 : index
    %3 = vector.load %arg4[%c0_3, %c0_4] : memref<8x1xf32, #tpu.memory_space<vmem>>, vector<8x1xf32>
    %4 = vector.broadcast %3 : vector<8x1xf32> to vector<8x128xf32>
    %5 = arith.mulf %2, %4 : vector<8x128xf32>
    %c0_5 = arith.constant 0 : index
    %c0_6 = arith.constant 0 : index
    %6 = vector.load %arg5[%c0_5, %c0_6] : memref<1x128xf32, #tpu.memory_space<vmem>>, vector<1x128xf32>
    %7 = vector.broadcast %6 : vector<1x128xf32> to vector<8x128xf32>
    %8 = arith.mulf %5, %7 : vector<8x128xf32>
    %c0_7 = arith.constant 0 : index
    %c0_8 = arith.constant 0 : index
    %9 = vector.load %arg6[%c0_7, %c0_8] : memref<8x128xf32, #tpu.memory_space<vmem>>, vector<8x128xf32>
    tpu.vector_store %arg6[%c0_7, %c0_8], %8 {strides = array<i32>} : memref<8x128xf32, #tpu.memory_space<vmem>>, vector<8x128xf32>,
    return
  }
  func.func @transform_0(%arg0: i32, %arg1: i32) -> (i32, i32) {
    %c0_i32 = arith.constant 0 : i32
    %c0_i32_0 = arith.constant 0 : i32
    return %arg0, %c0_i32 : i32, i32
  }
  func.func @transform_1(%arg0: i32, %arg1: i32) -> (i32, i32) {
    %c0_i32 = arith.constant 0 : i32
    %c0_i32_0 = arith.constant 0 : i32
    return %arg1, %c0_i32 : i32, i32
  }
  func.func @transform_2(%arg0: i32, %arg1: i32) -> (i32, i32) {
    %c0_i32 = arith.constant 0 : i32
    %c0_i32_0 = arith.constant 0 : i32
    return %arg0, %c0_i32 : i32, i32
  }
  func.func @transform_3(%arg0: i32, %arg1: i32) -> (i32, i32) {
    %c0_i32 = arith.constant 0 : i32
    %c0_i32_0 = arith.constant 0 : i32
    return %c0_i32, %arg1 : i32, i32
  }
  func.func @transform_4(%arg0: i32, %arg1: i32) -> (i32, i32) {
    %c0_i32 = arith.constant 0 : i32
    return %arg0, %arg1 : i32, i32
  }
}

</mosaic_0001>

<bundles_post_ra>
// kernel: tpu_custom_call.1
= control target key start
LH: loop header
LB: loop body
LE: loop exit
PB: predicated region body
PF: predicated region fallthrough
CT: control target
= control target key end

     0   :  { %9 = vsyncpa [#allocation3], 0  ;;  %s350_s0 = inlined_call_operand.vmem [shape: f32[8,128], index: 0, kind: input, shape index: {}]   ;;  %s351_s1 = inlined_call_operand.hbm [shape: f32[128,128], index: 1, kind: input, shape index: {}]   ;;  %s352_s2 = inlined_call_operand.vmem [shape: f32[8,1], index: 2, kind: input, shape index: {}]   ;;  %s353_s3 = inlined_call_operand.vmem [shape: f32[1,128], index: 3, kind: input, shape index: {}]   ;;  %s354_s4 = inlined_call_operand.hbm [shape: f32[8,128], index: 4, kind: output, shape index: {}]  }
   0x1   :  { %10 = vsyncpa [#allocation4], 0  ;;  %s284_s15 = smov [#allocation2]   ;;  %s236_s19 = scalar_lea.hbm %s351_s1, 2048 }
   0x2   :  { %s18_s16 = sshll.u32 %s284_s15, 4  ;;  %p237_p0 = scmp.ne.s32.totalorder %s351_s1, %s236_s19  ;;  %s19_s16 = int_to_ptr.vmem [resolvable:$true] %s18_s16 }
   0x3   :  { %p240_p1 = scmp.lt.u32.totalorder %s236_s19, %s351_s1 }
   0x5   :  { %p242_p2 = pnand %p240_p1, %p237_p0 }
   0x7   :  { %245 = shalt.err (!%p242_p2)
}
   0x8   :  { %s246_s24 = scalar_lea.vmem %s19_s16, 2048  ;;  %p251_p4 = scmp.lt.s32.totalorder %s19_s16, %s19_s16 }
   0x9   :  { %p247_p3 = scmp.ne.s32.totalorder %s19_s16, %s246_s24  ;;  %p252_p5 = scmp.lt.s32.totalorder %s246_s24, %s246_s24 }
   0xb   :  { %p253_p6 = por %p252_p5, %p251_p4 }
   0xd   :  { %p254_p7 = pnand %p253_p6, %p247_p3 }
   0xf   :  { %257 = shalt.err (!%p254_p7)
}
  0x10   :  { %s285_s25 = smov 128   ;;  %s286_s26 = smov 8  }
  0x11   :  { %24 = dma.hbm_to_vmem [thread:$0]  %s351_s1, 2048, %s19_s16, [#allocation3], %s285_s25, %s285_s25, %s286_s26  }
  0x12   :  { %280 = dma.done.wait [#allocation3], 2048  }
  0x13   :  { %281 = vsyncadd [#allocation3], 4294965248  ;;  %v287_v0 = vmov 0.0|0.0   ;;  %vm288_vm0 = vmmov 0   ;;  %v289_v1 = vmov 0.0   ;;  %v290_v2 = vmov 0  }
  0x14   :  { %203 = vmatprep.subr.bf16.mxu0 %v287_v0  ;;  %200 = vmatprep.mubr.msk.f32.mxu0 %vm288_vm0, %v289_v1  ;;  %v33_v3 = vld [vmem:[#allocation2] sm:$0xff]  ;;  %v34_v4 = vld [vmem:[#allocation2 + $0x8] sm:$0xff]  ;;  %v35_v6 = vld [vmem:[#allocation2 + $0x10] sm:$0xff]  ;;  %s291_s7 = smov [#allocation5]  }
  0x15   :  { %235 = vset.pattern.permute.xlu0 %v290_v2  ;;  %v204_v5 = vpack.c.bf16 %v34_v4, %v33_v3  ;;  %v36_v7 = vld [vmem:[#allocation2 + $0x18] sm:$0xff]  ;;  %v119_v8 = vld [vmem:[%s352_s2] sm:$0xff]  ;;  %v38_v11 = vld [vmem:[#allocation2 + $0x28] sm:$0xff]  ;;  %s141_s8 = sshll.u32 %s291_s7, 4  ;;  %s142_s8 = int_to_ptr.vmem [resolvable:$true] %s141_s8 }
  0x16   :  { %122 = vperm.xlu0 %235, %v119_v8   ;;  %v207_v9 = vpack.c.bf16 %v36_v7, %v35_v6  ;;  %v37_v10 = vld [vmem:[#allocation2 + $0x20] sm:$0xff]  ;;  %v39_v13 = vld [vmem:[#allocation2 + $0x30] sm:$0xff]  ;;  %v40_v14 = vld [vmem:[#allocation2 + $0x38] sm:$0xff]  ;;  %s258_s9 = scalar_lea.vmem %s142_s8, 128  ;;  %p263_p9 = scmp.lt.s32.totalorder %s142_s8, %s142_s8 }
  0x17   :  { %205 = vmatpush3.bf16.xpose.msra.mxu0 %v204_v5  ;;  %v210_v12 = vpack.c.bf16 %v38_v11, %v37_v10  ;;  %v213_v15 = vpack.c.bf16 %v40_v14, %v39_v13  ;;  %v41_v16 = vld [vmem:[#allocation2 + $0x40] sm:$0xff]  ;;  %v42_v17 = vld [vmem:[#allocation2 + $0x48] sm:$0xff]  ;;  %v43_v19 = vld [vmem:[#allocation2 + $0x50] sm:$0xff]  ;;  %p259_p8 = scmp.ne.s32.totalorder %s142_s8, %s258_s9  ;;  %p264_p10 = scmp.lt.s32.totalorder %s258_s9, %s258_s9 }
  0x18   :  { %206 = vmatprep.subr.bf16.mxu0 %v287_v0  ;;  %v216_v18 = vpack.c.bf16 %v42_v17, %v41_v16  ;;  %v44_v20 = vld [vmem:[#allocation2 + $0x58] sm:$0xff]  ;;  %v45_v22 = vld [vmem:[#allocation2 + $0x60] sm:$0xff]  ;;  %v46_v23 = vld [vmem:[#allocation2 + $0x68] sm:$0xff] }
  0x19   :  { %v219_v21 = vpack.c.bf16 %v44_v20, %v43_v19  ;;  %v222_v24 = vpack.c.bf16 %v46_v23, %v45_v22  ;;  %v47_v25 = vld [vmem:[#allocation2 + $0x70] sm:$0xff]  ;;  %v48_v26 = vld [vmem:[#allocation2 + $0x78] sm:$0xff]  ;;  %v32_v28 = vld [vmem:[%s350_s0] sm:$0xff]  ;;  %p265_p11 = por %p264_p10, %p263_p9 }
  0x1a   :  { %v225_v27 = vpack.c.bf16 %v48_v26, %v47_v25  ;;  %v150_v31 = vld [vmem:[%s353_s3] ss:$0 sm:$0xff] }
  0x1b   :  { %p266_p12 = pnand %p265_p11, %p259_p8 }
  0x1f   :  { %208 = vmatpush3.bf16.xpose.msra.mxu0 %v207_v9 }
  0x20   :  { %209 = vmatprep.subr.bf16.mxu0 %v287_v0 }
  0x27   :  { %211 = vmatpush3.bf16.xpose.msra.mxu0 %v210_v12 }
  0x28   :  { %212 = vmatprep.subr.bf16.mxu0 %v287_v0 }
  0x2f   :  { %214 = vmatpush3.bf16.xpose.msra.mxu0 %v213_v15 }
  0x30   :  { %215 = vmatprep.subr.bf16.mxu0 %v287_v0 }
  0x37   :  { %217 = vmatpush3.bf16.xpose.msra.mxu0 %v216_v18 }
  0x38   :  { %218 = vmatprep.subr.bf16.mxu0 %v287_v0 }
  0x3f   :  { %220 = vmatpush3.bf16.xpose.msra.mxu0 %v219_v21 }
  0x40   :  { %221 = vmatprep.subr.bf16.mxu0 %v287_v0 }
  0x47   :  { %223 = vmatpush3.bf16.xpose.msra.mxu0 %v222_v24 }
  0x48   :  { %224 = vmatprep.subr.bf16.mxu0 %v287_v0 }
  0x4f   :  { %226 = vmatpush3.bf16.xpose.msra.mxu0 %v225_v27 }
  0x56   :  { %201 = vmatmul.mubr.f32.vlgmr.msra.gmra.mrb[0].mxu0 %v32_v28 }
  0x95   :  { %v123_v29 = vpop.permute.xlu0 %122 }
 0x129   :  { %v115_v30 = vpop.f32.mrb[0].mxu0 }
 0x12a   :  { %v125_v32 = vmul.f32 %v123_v29, %v115_v30  ;;  %v202_v33 = vpop.f32.mrb[1].mxu0 }
 0x12c   :  { %v133_v34 = vmul.f32 %v150_v31, %v125_v32 }
 0x12e   :  { %134 = vst [vmem:[#allocation5] sm:$0xff] %v133_v34 }
 0x12f   :  { %269 = shalt.err (!%p266_p12)
}
 0x130   :  { %s270_s11 = scalar_lea.hbm %s354_s4, 128 }
 0x131   :  { %p271_p13 = scmp.ne.s32.totalorder %s354_s4, %s270_s11  ;;  %p274_p0 = scmp.lt.u32.totalorder %s270_s11, %s354_s4 }
 0x133   :  { %p276_p1 = pnand %p274_p0, %p271_p13 }
 0x135   :  { %279 = shalt.err (!%p276_p1)
}
 0x136   :  { %144 = dma.vmem_to_hbm [thread:$0]  %s142_s8, 128, %s354_s4, [#allocation4]  }
 0x137   :  { %282 = dma.done.wait [#allocation4], 128  }
 0x138   :  { %283 = vsyncadd [#allocation4], 4294967168 }
 0x139   :  { %148 = vsyncpa [#allocation3], 1 }
 0x13a   :  { %149 = vsyncpa [#allocation4], 1 }

</bundles_post_ra>
